<compile_context>
chip_gen: v7x
topology: tpu7x:2x2x1
jax: 0.10.0
libtpu: 0.0.40
codegen_flags: <defaults>
</compile_context>

<pallas_src>
import jax
import jax.numpy as jnp
from jax.experimental import pallas as pl
from jax.experimental.pallas import tpu as pltpu

# ---- sizes -----------------------------------------------------------------
B, N, C = 2, 16, 8
M = C                             # matrix_size (bmm requires C == matrix_size)
LNET = [(C, 32), (32, 64)]        # SharedFCBlock dims (Conv1d k=1 == per-point Linear)
GNET = [(64, 32), (32, 16)]       # FCBlock dims
FC_IN, FC_OUT = GNET[-1][1], M * M

D0, D1, D2 = C, LNET[0][1], LNET[1][1]      # 8, 32, 64
D3, D4 = GNET[0][1], GNET[1][1]             # 32, 16

# Packed-parameter slab layout (sublane-stacked, 128 lanes, all offsets multiples of 8).
O_WL0 = 0                    # (D0, D1)  rows   0:8
O_WL1 = O_WL0 + D0           # (D1, D2)  rows   8:40
O_WG0 = O_WL1 + D1           # (D2, D3)  rows  40:104
O_WG1 = O_WG0 + D2           # (D3, D4)  rows 104:136
O_WFC = O_WG1 + D3           # (D4, M*M) rows 136:152
O_BIAS = O_WFC + D4          # biases: one per row, rows 152..156
P_ROWS = O_BIAS + 8          # 160 (bias block rounded up to a full sublane tile)
P_COLS = 128

# Set to jnp.bfloat16 on v6e/v7x to halve weight/input DMA bytes (MXU-native, f32 accum);
# validation tolerance below adapts automatically. f32 = exact PyTorch semantics.
COMPUTE_DTYPE = jnp.float32


# ---- fused kernel ----------------------------------------------------------
def transform_kernel(x_ref, p_ref, y_ref, w_ref):
    """Whole Transform forward in one invocation.

    x_ref : (B*N, C)        all batches' points as one slab
    p_ref : (P_ROWS, 128)   packed weights + biases (single DMA)
    y_ref : (B*N, M)        y = bmm(x, W) flattened over batch
    w_ref : (B, M*M)        flat transform matrices (lane-dense store)
    """
    f32 = jnp.float32
    x = x_ref[...]                                                   # (B*N, C)

    def dense(h, row0, fin, fout, bias_row):
        w = p_ref[row0:row0 + fin, 0:fout]                           # aligned static slice
        b = p_ref[bias_row:bias_row + 1, 0:fout]
        return (jnp.dot(h.astype(w.dtype), w, preferred_element_type=f32)
                + b.astype(f32))

    # lnet: shared per-point FC blocks (Conv1d kernel-size 1) + ReLU, all rows at once.
    h = jnp.maximum(dense(x, O_WL0, D0, D1, O_BIAS + 0), 0.0)        # (B*N, 32)
    h = jnp.maximum(dense(h, O_WL1, D1, D2, O_BIAS + 1), 0.0)        # (B*N, 64)

    # torch.max(y, 1, True)[0]: per-batch max over the point axis.
    # (B*N, D2) -> (B, N, D2) is a layout no-op (N multiple of 8, lane dim unchanged).
    g = jnp.max(h.reshape(B, N, D2), axis=1)                         # (B, 64)

    # gnet: FC blocks + ReLU
    g = jnp.maximum(dense(g, O_WG0, D2, D3, O_BIAS + 2), 0.0)        # (B, 32)
    g = jnp.maximum(dense(g, O_WG1, D3, D4, O_BIAS + 3), 0.0)        # (B, 16)

    # final fc -> flat transform matrices, stored lane-dense as (B, M*M)
    w_flat = dense(g, O_WFC, D4, M * M, O_BIAS + 4)                  # (B, 64) f32
    w_ref[...] = w_flat.astype(w_ref.dtype)

    # fused bmm: y[b] = x[b] @ reshape(w_flat[b], (M, M)), done as pure VPU
    # broadcast-FMAs (no (M, M) materialization, no XLU concat, no tiny MXU dots):
    #   y_b = sum_c x_b[:, c:c+1] * w_flat[b, c*M:(c+1)*M]
    for b in range(B):
        xb = x[b * N:(b + 1) * N, :].astype(f32)                     # (N, C)
        yb = xb[:, 0:1] * w_flat[b:b + 1, 0:M]
        for c in range(1, C):
            yb = yb + xb[:, c:c + 1] * w_flat[b:b + 1, c * M:(c + 1) * M]
        y_ref[b * N:(b + 1) * N, :] = yb.astype(y_ref.dtype)         # aligned store


# ---- wrapper ---------------------------------------------------------------
def pack_params(params, dtype=jnp.float32):
    """Pack all weights/biases into one (P_ROWS, 128) slab. Done once, outside jit."""
    (wl0, bl0), (wl1, bl1), (wg0, bg0), (wg1, bg1), (wfc, bfc) = params
    slab = jnp.zeros((P_ROWS, P_COLS), dtype)

    def put(s, arr, r):
        a = jnp.asarray(arr, dtype)
        return s.at[r:r + a.shape[0], 0:a.shape[1]].set(a)

    slab = put(slab, wl0, O_WL0)
    slab = put(slab, wl1, O_WL1)
    slab = put(slab, wg0, O_WG0)
    slab = put(slab, wg1, O_WG1)
    slab = put(slab, wfc, O_WFC)
    slab = put(slab, bl0, O_BIAS + 0)
    slab = put(slab, bl1, O_BIAS + 1)
    slab = put(slab, bg0, O_BIAS + 2)
    slab = put(slab, bg1, O_BIAS + 3)
    slab = put(slab, bfc, O_BIAS + 4)
    return slab


@jax.jit
def transform_forward(x, pslab):
    # Free wrapper-side reshape to a single row slab; 2 input DMAs total (x + weights).
    x2 = x.reshape(B * N, C).astype(pslab.dtype)

    vmem = pl.BlockSpec(memory_space=pltpu.MemorySpace.VMEM)
    y2, w_flat = pl.pallas_call(
        transform_kernel,
        out_shape=(jax.ShapeDtypeStruct((B * N, M), jnp.float32),
                   jax.ShapeDtypeStruct((B, M * M), jnp.float32)),
        in_specs=[vmem, vmem],
        out_specs=(vmem, vmem),
    )(x2, pslab)

    # Free contiguous reshapes back to the module's output shapes.
    return y2.reshape(B, N, M), w_flat.reshape(B, M, M)


# ---- deterministic parameter init & reference ------------------------------
def init_linear(key, fin, fout):
    kw, kb = jax.random.split(key)
    w = jax.random.normal(kw, (fin, fout), jnp.float32) * 0.1
    b = jax.random.normal(kb, (1, fout), jnp.float32) * 0.1
    return w, b


def reference_forward(x, params):
    hi = jax.lax.Precision.HIGHEST
    (wl0, bl0), (wl1, bl1), (wg0, bg0), (wg1, bg1), (wfc, bfc) = params
    h = jnp.maximum(jnp.einsum('bnc,cf->bnf', x, wl0, precision=hi) + bl0, 0.0)
    h = jnp.maximum(jnp.einsum('bnf,fg->bng', h, wl1, precision=hi) + bl1, 0.0)
    g = jnp.max(h, axis=1)                                           # (B, 64)
    g = jnp.maximum(jnp.dot(g, wg0, precision=hi) + bg0, 0.0)
    g = jnp.maximum(jnp.dot(g, wg1, precision=hi) + bg1, 0.0)
    w = (jnp.dot(g, wfc, precision=hi) + bfc).reshape(B, M, M)
    y = jnp.einsum('bnc,bcm->bnm', x, w, precision=hi)
    return y, w


if __name__ == "__main__":
    key = jax.random.PRNGKey(0)
    kx, k0, k1, k2, k3, k4 = jax.random.split(key, 6)

    params = [
        init_linear(k0, *LNET[0]),
        init_linear(k1, *LNET[1]),
        init_linear(k2, *GNET[0]),
        init_linear(k3, *GNET[1]),
        init_linear(k4, FC_IN, FC_OUT),
    ]
    x = jax.random.normal(kx, (B, N, C), jnp.float32)

    # Pack once; reuse across every call (amortizes packing + lets jit cache the call).
    pslab = pack_params(params, COMPUTE_DTYPE)

    y, w = transform_forward(x, pslab)
    y = jax.block_until_ready(y)
    w = jax.block_until_ready(w)

    y_ref, w_ref = reference_forward(x, params)
    tol = 1e-4 if COMPUTE_DTYPE == jnp.float32 else 3e-2
    assert y.shape == (B, N, M) and w.shape == (B, M, M)
    assert jnp.allclose(w, w_ref, atol=tol, rtol=tol)
    assert jnp.allclose(y, y_ref, atol=tol, rtol=tol)

    print("KERNEL_OK")
</pallas_src>

<mosaic_0001>
module attributes {stable_mosaic.version = 11 : i64} {
  func.func @transform_kernel(%arg0: memref<32x8xf32, #tpu.memory_space<vmem>>, %arg1: memref<160x128xf32, #tpu.memory_space<vmem>>, %arg2: memref<32x8xf32, #tpu.memory_space<vmem>>, %arg3: memref<2x64xf32, #tpu.memory_space<vmem>>) attributes {dimension_semantics = [], scalar_prefetch = 0 : i64, scratch_operands = 0 : i64, tpu.core_type = #tpu.core_type<tc>} {
    %c0 = arith.constant 0 : index
    %c0_0 = arith.constant 0 : index
    %0 = vector.load %arg0[%c0, %c0_0] : memref<32x8xf32, #tpu.memory_space<vmem>>, vector<32x8xf32>
    %c0_1 = arith.constant 0 : index
    %c0_2 = arith.constant 0 : index
    %1 = vector.load %arg1[%c0_1, %c0_2] : memref<160x128xf32, #tpu.memory_space<vmem>>, vector<8x32xf32>
    %c152 = arith.constant 152 : index
    %c0_3 = arith.constant 0 : index
    %2 = vector.load %arg1[%c152, %c0_3] : memref<160x128xf32, #tpu.memory_space<vmem>>, vector<1x32xf32>
    %cst = arith.constant dense<0.000000e+00> : vector<32x32xf32>
    %3 = tpu.matmul %0, %1, %cst {dimension_numbers = #tpu.dot_dimension_numbers<[1], [0], [0], [1], [0, 0, 1, 1], [], []>} : vector<32x8xf32>, vector<8x32xf32>, vector<32x32xf32> -> vector<32x32xf32>
    %4 = vector.broadcast %2 : vector<1x32xf32> to vector<32x32xf32>
    %5 = arith.addf %3, %4 : vector<32x32xf32>
    %cst_4 = arith.constant 0.000000e+00 : f32
    %6 = vector.broadcast %cst_4 : f32 to vector<32x32xf32>
    %7 = arith.maximumf %5, %6 : vector<32x32xf32>
    %c8 = arith.constant 8 : index
    %c0_5 = arith.constant 0 : index
    %8 = vector.load %arg1[%c8, %c0_5] : memref<160x128xf32, #tpu.memory_space<vmem>>, vector<32x64xf32>
    %c153 = arith.constant 153 : index
    %c0_6 = arith.constant 0 : index
    %9 = vector.load %arg1[%c153, %c0_6] : memref<160x128xf32, #tpu.memory_space<vmem>>, vector<1x64xf32>
    %cst_7 = arith.constant dense<0.000000e+00> : vector<32x64xf32>
    %10 = tpu.matmul %7, %8, %cst_7 {dimension_numbers = #tpu.dot_dimension_numbers<[1], [0], [0], [1], [0, 0, 1, 1], [], []>} : vector<32x32xf32>, vector<32x64xf32>, vector<32x64xf32> -> vector<32x64xf32>
    %11 = vector.broadcast %9 : vector<1x64xf32> to vector<32x64xf32>
    %12 = arith.addf %10, %11 : vector<32x64xf32>
    %cst_8 = arith.constant 0.000000e+00 : f32
    %13 = vector.broadcast %cst_8 : f32 to vector<32x64xf32>
    %14 = arith.maximumf %12, %13 : vector<32x64xf32>
    %15 = vector.shape_cast %14 : vector<32x64xf32> to vector<2x16x64xf32>
    %cst_9 = arith.constant dense<0xFF800000> : vector<2x64xf32>
    %16 = vector.multi_reduction <maximumf>, %15, %cst_9 [1] : vector<2x16x64xf32> to vector<2x64xf32>
    %c40 = arith.constant 40 : index
    %c0_10 = arith.constant 0 : index
    %17 = vector.load %arg1[%c40, %c0_10] : memref<160x128xf32, #tpu.memory_space<vmem>>, vector<64x32xf32>
    %c154 = arith.constant 154 : index
    %c0_11 = arith.constant 0 : index
    %18 = vector.load %arg1[%c154, %c0_11] : memref<160x128xf32, #tpu.memory_space<vmem>>, vector<1x32xf32>
    %cst_12 = arith.constant dense<0.000000e+00> : vector<2x32xf32>
    %19 = tpu.matmul %16, %17, %cst_12 {dimension_numbers = #tpu.dot_dimension_numbers<[1], [0], [0], [1], [0, 0, 1, 1], [], []>} : vector<2x64xf32>, vector<64x32xf32>, vector<2x32xf32> -> vector<2x32xf32>
    %20 = vector.broadcast %18 : vector<1x32xf32> to vector<2x32xf32>
    %21 = arith.addf %19, %20 : vector<2x32xf32>
    %cst_13 = arith.constant 0.000000e+00 : f32
    %22 = vector.broadcast %cst_13 : f32 to vector<2x32xf32>
    %23 = arith.maximumf %21, %22 : vector<2x32xf32>
    %c104 = arith.constant 104 : index
    %c0_14 = arith.constant 0 : index
    %24 = vector.load %arg1[%c104, %c0_14] : memref<160x128xf32, #tpu.memory_space<vmem>>, vector<32x16xf32>
    %c155 = arith.constant 155 : index
    %c0_15 = arith.constant 0 : index
    %25 = vector.load %arg1[%c155, %c0_15] : memref<160x128xf32, #tpu.memory_space<vmem>>, vector<1x16xf32>
    %cst_16 = arith.constant dense<0.000000e+00> : vector<2x16xf32>
    %26 = tpu.matmul %23, %24, %cst_16 {dimension_numbers = #tpu.dot_dimension_numbers<[1], [0], [0], [1], [0, 0, 1, 1], [], []>} : vector<2x32xf32>, vector<32x16xf32>, vector<2x16xf32> -> vector<2x16xf32>
    %27 = vector.broadcast %25 : vector<1x16xf32> to vector<2x16xf32>
    %28 = arith.addf %26, %27 : vector<2x16xf32>
    %cst_17 = arith.constant 0.000000e+00 : f32
    %29 = vector.broadcast %cst_17 : f32 to vector<2x16xf32>
    %30 = arith.maximumf %28, %29 : vector<2x16xf32>
    %c136 = arith.constant 136 : index
    %c0_18 = arith.constant 0 : index
    %31 = vector.load %arg1[%c136, %c0_18] : memref<160x128xf32, #tpu.memory_space<vmem>>, vector<16x64xf32>
    %c156 = arith.constant 156 : index
    %c0_19 = arith.constant 0 : index
    %32 = vector.load %arg1[%c156, %c0_19] : memref<160x128xf32, #tpu.memory_space<vmem>>, vector<1x64xf32>
    %cst_20 = arith.constant dense<0.000000e+00> : vector<2x64xf32>
    %33 = tpu.matmul %30, %31, %cst_20 {dimension_numbers = #tpu.dot_dimension_numbers<[1], [0], [0], [1], [0, 0, 1, 1], [], []>} : vector<2x16xf32>, vector<16x64xf32>, vector<2x64xf32> -> vector<2x64xf32>
    %34 = vector.broadcast %32 : vector<1x64xf32> to vector<2x64xf32>
    %35 = arith.addf %33, %34 : vector<2x64xf32>
    %c0_21 = arith.constant 0 : index
    %c0_22 = arith.constant 0 : index
    %36 = vector.load %arg3[%c0_21, %c0_22] : memref<2x64xf32, #tpu.memory_space<vmem>>, vector<2x64xf32>
    tpu.vector_store %arg3[%c0_21, %c0_22], %35 {strides = array<i32>} : memref<2x64xf32, #tpu.memory_space<vmem>>, vector<2x64xf32>,
    %37 = vector.extract_strided_slice %0 {offsets = [0, 0], sizes = [16, 8], strides = [1, 1]} : vector<32x8xf32> to vector<16x8xf32>
    %38 = vector.extract_strided_slice %37 {offsets = [0, 0], sizes = [16, 1], strides = [1, 1]} : vector<16x8xf32> to vector<16x1xf32>
    %39 = vector.extract_strided_slice %35 {offsets = [0, 0], sizes = [1, 8], strides = [1, 1]} : vector<2x64xf32> to vector<1x8xf32>
    %40 = vector.broadcast %38 : vector<16x1xf32> to vector<16x8xf32>
    %41 = vector.broadcast %39 : vector<1x8xf32> to vector<16x8xf32>
    %42 = arith.mulf %40, %41 : vector<16x8xf32>
    %43 = vector.extract_strided_slice %37 {offsets = [0, 1], sizes = [16, 1], strides = [1, 1]} : vector<16x8xf32> to vector<16x1xf32>
    %44 = vector.extract_strided_slice %35 {offsets = [0, 8], sizes = [1, 8], strides = [1, 1]} : vector<2x64xf32> to vector<1x8xf32>
    %45 = vector.broadcast %43 : vector<16x1xf32> to vector<16x8xf32>
    %46 = vector.broadcast %44 : vector<1x8xf32> to vector<16x8xf32>
    %47 = arith.mulf %45, %46 : vector<16x8xf32>
    %48 = arith.addf %42, %47 : vector<16x8xf32>
    %49 = vector.extract_strided_slice %37 {offsets = [0, 2], sizes = [16, 1], strides = [1, 1]} : vector<16x8xf32> to vector<16x1xf32>
    %50 = vector.extract_strided_slice %35 {offsets = [0, 16], sizes = [1, 8], strides = [1, 1]} : vector<2x64xf32> to vector<1x8xf32>
    %51 = vector.broadcast %49 : vector<16x1xf32> to vector<16x8xf32>
    %52 = vector.broadcast %50 : vector<1x8xf32> to vector<16x8xf32>
    %53 = arith.mulf %51, %52 : vector<16x8xf32>
    %54 = arith.addf %48, %53 : vector<16x8xf32>
    %55 = vector.extract_strided_slice %37 {offsets = [0, 3], sizes = [16, 1], strides = [1, 1]} : vector<16x8xf32> to vector<16x1xf32>
    %56 = vector.extract_strided_slice %35 {offsets = [0, 24], sizes = [1, 8], strides = [1, 1]} : vector<2x64xf32> to vector<1x8xf32>
    %57 = vector.broadcast %55 : vector<16x1xf32> to vector<16x8xf32>
    %58 = vector.broadcast %56 : vector<1x8xf32> to vector<16x8xf32>
    %59 = arith.mulf %57, %58 : vector<16x8xf32>
    %60 = arith.addf %54, %59 : vector<16x8xf32>
    %61 = vector.extract_strided_slice %37 {offsets = [0, 4], sizes = [16, 1], strides = [1, 1]} : vector<16x8xf32> to vector<16x1xf32>
    %62 = vector.extract_strided_slice %35 {offsets = [0, 32], sizes = [1, 8], strides = [1, 1]} : vector<2x64xf32> to vector<1x8xf32>
    %63 = vector.broadcast %61 : vector<16x1xf32> to vector<16x8xf32>
    %64 = vector.broadcast %62 : vector<1x8xf32> to vector<16x8xf32>
    %65 = arith.mulf %63, %64 : vector<16x8xf32>
    %66 = arith.addf %60, %65 : vector<16x8xf32>
    %67 = vector.extract_strided_slice %37 {offsets = [0, 5], sizes = [16, 1], strides = [1, 1]} : vector<16x8xf32> to vector<16x1xf32>
    %68 = vector.extract_strided_slice %35 {offsets = [0, 40], sizes = [1, 8], strides = [1, 1]} : vector<2x64xf32> to vector<1x8xf32>
    %69 = vector.broadcast %67 : vector<16x1xf32> to vector<16x8xf32>
    %70 = vector.broadcast %68 : vector<1x8xf32> to vector<16x8xf32>
    %71 = arith.mulf %69, %70 : vector<16x8xf32>
    %72 = arith.addf %66, %71 : vector<16x8xf32>
    %73 = vector.extract_strided_slice %37 {offsets = [0, 6], sizes = [16, 1], strides = [1, 1]} : vector<16x8xf32> to vector<16x1xf32>
    %74 = vector.extract_strided_slice %35 {offsets = [0, 48], sizes = [1, 8], strides = [1, 1]} : vector<2x64xf32> to vector<1x8xf32>
    %75 = vector.broadcast %73 : vector<16x1xf32> to vector<16x8xf32>
    %76 = vector.broadcast %74 : vector<1x8xf32> to vector<16x8xf32>
    %77 = arith.mulf %75, %76 : vector<16x8xf32>
    %78 = arith.addf %72, %77 : vector<16x8xf32>
    %79 = vector.extract_strided_slice %37 {offsets = [0, 7], sizes = [16, 1], strides = [1, 1]} : vector<16x8xf32> to vector<16x1xf32>
    %80 = vector.extract_strided_slice %35 {offsets = [0, 56], sizes = [1, 8], strides = [1, 1]} : vector<2x64xf32> to vector<1x8xf32>
    %81 = vector.broadcast %79 : vector<16x1xf32> to vector<16x8xf32>
    %82 = vector.broadcast %80 : vector<1x8xf32> to vector<16x8xf32>
    %83 = arith.mulf %81, %82 : vector<16x8xf32>
    %84 = arith.addf %78, %83 : vector<16x8xf32>
    %c0_23 = arith.constant 0 : index
    %c0_24 = arith.constant 0 : index
    %85 = vector.load %arg2[%c0_23, %c0_24] : memref<32x8xf32, #tpu.memory_space<vmem>>, vector<16x8xf32>
    tpu.vector_store %arg2[%c0_23, %c0_24], %84 {strides = array<i32>} : memref<32x8xf32, #tpu.memory_space<vmem>>, vector<16x8xf32>,
    %86 = vector.extract_strided_slice %0 {offsets = [16, 0], sizes = [16, 8], strides = [1, 1]} : vector<32x8xf32> to vector<16x8xf32>
    %87 = vector.extract_strided_slice %86 {offsets = [0, 0], sizes = [16, 1], strides = [1, 1]} : vector<16x8xf32> to vector<16x1xf32>
    %88 = vector.extract_strided_slice %35 {offsets = [1, 0], sizes = [1, 8], strides = [1, 1]} : vector<2x64xf32> to vector<1x8xf32>
    %89 = vector.broadcast %87 : vector<16x1xf32> to vector<16x8xf32>
    %90 = vector.broadcast %88 : vector<1x8xf32> to vector<16x8xf32>
    %91 = arith.mulf %89, %90 : vector<16x8xf32>
    %92 = vector.extract_strided_slice %86 {offsets = [0, 1], sizes = [16, 1], strides = [1, 1]} : vector<16x8xf32> to vector<16x1xf32>
    %93 = vector.extract_strided_slice %35 {offsets = [1, 8], sizes = [1, 8], strides = [1, 1]} : vector<2x64xf32> to vector<1x8xf32>
    %94 = vector.broadcast %92 : vector<16x1xf32> to vector<16x8xf32>
    %95 = vector.broadcast %93 : vector<1x8xf32> to vector<16x8xf32>
    %96 = arith.mulf %94, %95 : vector<16x8xf32>
    %97 = arith.addf %91, %96 : vector<16x8xf32>
    %98 = vector.extract_strided_slice %86 {offsets = [0, 2], sizes = [16, 1], strides = [1, 1]} : vector<16x8xf32> to vector<16x1xf32>
    %99 = vector.extract_strided_slice %35 {offsets = [1, 16], sizes = [1, 8], strides = [1, 1]} : vector<2x64xf32> to vector<1x8xf32>
    %100 = vector.broadcast %98 : vector<16x1xf32> to vector<16x8xf32>
    %101 = vector.broadcast %99 : vector<1x8xf32> to vector<16x8xf32>
    %102 = arith.mulf %100, %101 : vector<16x8xf32>
    %103 = arith.addf %97, %102 : vector<16x8xf32>
    %104 = vector.extract_strided_slice %86 {offsets = [0, 3], sizes = [16, 1], strides = [1, 1]} : vector<16x8xf32> to vector<16x1xf32>
    %105 = vector.extract_strided_slice %35 {offsets = [1, 24], sizes = [1, 8], strides = [1, 1]} : vector<2x64xf32> to vector<1x8xf32>
    %106 = vector.broadcast %104 : vector<16x1xf32> to vector<16x8xf32>
    %107 = vector.broadcast %105 : vector<1x8xf32> to vector<16x8xf32>
    %108 = arith.mulf %106, %107 : vector<16x8xf32>
    %109 = arith.addf %103, %108 : vector<16x8xf32>
    %110 = vector.extract_strided_slice %86 {offsets = [0, 4], sizes = [16, 1], strides = [1, 1]} : vector<16x8xf32> to vector<16x1xf32>
    %111 = vector.extract_strided_slice %35 {offsets = [1, 32], sizes = [1, 8], strides = [1, 1]} : vector<2x64xf32> to vector<1x8xf32>
    %112 = vector.broadcast %110 : vector<16x1xf32> to vector<16x8xf32>
    %113 = vector.broadcast %111 : vector<1x8xf32> to vector<16x8xf32>
    %114 = arith.mulf %112, %113 : vector<16x8xf32>
    %115 = arith.addf %109, %114 : vector<16x8xf32>
    %116 = vector.extract_strided_slice %86 {offsets = [0, 5], sizes = [16, 1], strides = [1, 1]} : vector<16x8xf32> to vector<16x1xf32>
    %117 = vector.extract_strided_slice %35 {offsets = [1, 40], sizes = [1, 8], strides = [1, 1]} : vector<2x64xf32> to vector<1x8xf32>
    %118 = vector.broadcast %116 : vector<16x1xf32> to vector<16x8xf32>
    %119 = vector.broadcast %117 : vector<1x8xf32> to vector<16x8xf32>
    %120 = arith.mulf %118, %119 : vector<16x8xf32>
    %121 = arith.addf %115, %120 : vector<16x8xf32>
    %122 = vector.extract_strided_slice %86 {offsets = [0, 6], sizes = [16, 1], strides = [1, 1]} : vector<16x8xf32> to vector<16x1xf32>
    %123 = vector.extract_strided_slice %35 {offsets = [1, 48], sizes = [1, 8], strides = [1, 1]} : vector<2x64xf32> to vector<1x8xf32>
    %124 = vector.broadcast %122 : vector<16x1xf32> to vector<16x8xf32>
    %125 = vector.broadcast %123 : vector<1x8xf32> to vector<16x8xf32>
    %126 = arith.mulf %124, %125 : vector<16x8xf32>
    %127 = arith.addf %121, %126 : vector<16x8xf32>
    %128 = vector.extract_strided_slice %86 {offsets = [0, 7], sizes = [16, 1], strides = [1, 1]} : vector<16x8xf32> to vector<16x1xf32>
    %129 = vector.extract_strided_slice %35 {offsets = [1, 56], sizes = [1, 8], strides = [1, 1]} : vector<2x64xf32> to vector<1x8xf32>
    %130 = vector.broadcast %128 : vector<16x1xf32> to vector<16x8xf32>
    %131 = vector.broadcast %129 : vector<1x8xf32> to vector<16x8xf32>
    %132 = arith.mulf %130, %131 : vector<16x8xf32>
    %133 = arith.addf %127, %132 : vector<16x8xf32>
    %c16 = arith.constant 16 : index
    %c0_25 = arith.constant 0 : index
    %134 = vector.load %arg2[%c16, %c0_25] : memref<32x8xf32, #tpu.memory_space<vmem>>, vector<16x8xf32>
    tpu.vector_store %arg2[%c16, %c0_25], %133 {strides = array<i32>} : memref<32x8xf32, #tpu.memory_space<vmem>>, vector<16x8xf32>,
    return
  }
}

</mosaic_0001>

<bundles_post_ra>
// kernel: transform_forward.1
= control target key start
LH: loop header
LB: loop body
LE: loop exit
PB: predicated region body
PF: predicated region fallthrough
CT: control target
= control target key end

     0   :  { %9 = vsyncpa [#allocation3], 0  ;;  %s1044_s12 = smov [#allocation2]   ;;  %s1239_s0 = inlined_call_operand.vmem [shape: f32[32,8], index: 0, kind: input, shape index: {}]   ;;  %s1240_s1 = inlined_call_operand.hbm [shape: f32[160,128], index: 1, kind: input, shape index: {}]   ;;  %s1241_s2 = inlined_call_operand.vmem [shape: f32[32,8], index: 2, kind: output, shape index: {0}]   ;;  %s1242_s3 = inlined_call_operand.vmem [shape: f32[2,64], index: 3, kind: output, shape index: {1}]  }
   0x1   :  { %s17_s13 = sshll.u32 %s1044_s12, 4  ;;  %s1020_s16 = scalar_lea.hbm %s1240_s1, 2560  ;;  %s18_s13 = int_to_ptr.vmem [resolvable:$true] %s17_s13 }
   0x2   :  { %p1021_p0 = scmp.ne.s32.totalorder %s1240_s1, %s1020_s16  ;;  %p1024_p1 = scmp.lt.u32.totalorder %s1020_s16, %s1240_s1 }
   0x4   :  { %p1026_p2 = pnand %p1024_p1, %p1021_p0 }
   0x6   :  { %1029 = shalt.err (!%p1026_p2)
}
   0x7   :  { %s1030_s21 = scalar_lea.vmem %s18_s13, 2560  ;;  %p1035_p4 = scmp.lt.s32.totalorder %s18_s13, %s18_s13 }
   0x8   :  { %p1031_p3 = scmp.ne.s32.totalorder %s18_s13, %s1030_s21  ;;  %p1036_p5 = scmp.lt.s32.totalorder %s1030_s21, %s1030_s21 }
   0xa   :  { %p1037_p6 = por %p1036_p5, %p1035_p4 }
   0xc   :  { %p1038_p7 = pnand %p1037_p6, %p1031_p3 }
   0xe   :  { %1041 = shalt.err (!%p1038_p7)
}
   0xf   :  { %s1045_s22 = smov 128   ;;  %s1046_s23 = smov 8  }
  0x10   :  { %23 = dma.hbm_to_vmem [thread:$0]  %s1240_s1, 2560, %s18_s13, [#allocation3], %s1045_s22, %s1045_s22, %s1046_s23  }
  0x11   :  { %1042 = dma.done.wait [#allocation3], 2560  }
  0x12   :  { %1043 = vsyncadd [#allocation3], 4294964736  ;;  %vm37_vm0 = vcmask 64512   ;;  %v31_v0 = vld [vmem:[#allocation2] sm:$0xff]  ;;  %v1105_v2 = vld [vmem:[%s1239_s0 + $0x8] sm:$0xff]  ;;  %vm148_vm1 = vcmask 261120  }
  0x13   :  { %v1100_v1 = vld [vmem:[%s1239_s0] sm:$0xff]  ;;  %892 = vmatprep.subr.mxu0 %v31_v0  ;;  %v1112_v3 = vld [vmem:[%s1239_s0 + $0x10] sm:$0xff]  ;;  %v139_v4 = vld [vmem:[#allocation2 + $0x8] sm:$0xff]  ;;  %v1047_v27 = vmov 0.0|0.0   ;;  %vm1048_vm2 = vmmov 0   ;;  %v1049_v37 = vmov 0.0  }
  0x14   :  { %894 = vmatprep.mubr.msk.f32.mxu0 %vm37_vm0, %v1100_v1  ;;  %893 = vmatpush3.msra.mxu0 %v31_v0  ;;  %v140_v5 = vld [vmem:[#allocation2 + $0x10] sm:$0xff]  ;;  %v1121_v7 = vld [vmem:[%s1239_s0 + $0x18] sm:$0xff]  ;;  %v142_v9 = vld [vmem:[#allocation2 + $0x20] sm:$0xff]  ;;  %vm250_vm3 = vcmask 523264   ;;  %vm284_vm4 = vcmask 1041409   ;;  %vm449_vm5 = vcmask 130048  }
  0x15   :  { %895 = vmatmul.mubr.msk.f32.vlgmr.msra.gmra.mrb[0].mxu0 %vm37_vm0, %v1105_v2  ;;  %v951_v6 = vpack.c.bf16 %v140_v5, %v139_v4  ;;  %v141_v8 = vld [vmem:[#allocation2 + $0x18] sm:$0xff]  ;;  %v269_v24 = vld [vmem:[#allocation2 + $0x28] sm:$0xff]  ;;  %v270_v25 = vld [vmem:[#allocation2 + $0x30] sm:$0xff]  ;;  %959 = vmatprep.subr.bf16.mxu0 %v1047_v27  ;;  %vm523_vm6 = vcmask 517120   ;;  %s1058_s7 = smov 120   ;;  %s1060_s8 = smov 104  }
  0x16   :  { %897 = vmatprep.mubr.msk.f32.mxu0 %vm37_vm0, %v1112_v3  ;;  %v955_v10 = vpack.c.bf16 %v142_v9, %v141_v8  ;;  %v846_v11 = vld [vmem:[#allocation2 + $0x98] ss:$0 sm:$0xff]  ;;  %v960_v26 = vpack.c.bf16 %v270_v25, %v269_v24  ;;  %v272_v29 = vld [vmem:[#allocation2 + $0x40] sm:$0xff]  ;;  %v273_v31 = vld [vmem:[#allocation2 + $0x48] sm:$0xff]  ;;  %v1050_v24 = vmov 1   ;;  %v1051_v25 = vmov 2  }
  0x17   :  { %952 = vmatprep.subr.bf16.mxu1 %v951_v6  ;;  %v271_v28 = vld [vmem:[#allocation2 + $0x38] sm:$0xff]  ;;  %v274_v32 = vld [vmem:[#allocation2 + $0x50] sm:$0xff]  ;;  %v276_v35 = vld [vmem:[#allocation2 + $0x60] sm:$0xff]  ;;  %1001 = vset.pattern.permute.xlu1 %v1050_v24  ;;  %s1061_s9 = smov 96   ;;  %s1062_s10 = smov 88  }
  0x18   :  { %954 = vmatpush3.bf16.msra.mxu1 %v951_v6  ;;  %961 = vmatpush3.bf16.msra.mxu0 %v960_v26  ;;  %v963_v30 = vpack.c.bf16 %v272_v29, %v271_v28  ;;  %v966_v33 = vpack.c.bf16 %v274_v32, %v273_v31  ;;  %v275_v34 = vld [vmem:[#allocation2 + $0x58] sm:$0xff]  ;;  %v359_v38 = vld [vmem:[#allocation2 + $0x68] sm:$0xff]  ;;  %v360_v39 = vld [vmem:[#allocation2 + $0x70] sm:$0xff]  ;;  %v1052_v26 = vmov 3   ;;  %v1054_v28 = vmov 5   ;;  %s1063_s11 = smov 80  }
  0x19   :  { %898 = vmatmul.mubr.msk.f32.gmra.mrb[2].mxu0 %vm37_vm0, %v1121_v7  ;;  %956 = vmatprep.subr.bf16.mxu1 %v955_v10  ;;  %v969_v36 = vpack.c.bf16 %v276_v35, %v275_v34  ;;  %v972_v40 = vpack.c.bf16 %v360_v39, %v359_v38  ;;  %v851_v41 = vld [vmem:[#allocation2 + $0x99] ss:$0 sm:$0xff]  ;;  %v1055_v29 = vmov 6   ;;  %v1057_v31 = vmov 0   ;;  %v858_v32 = vld [vmem:[#allocation2 + $0x9b] ss:$0 sm:$0xff] }
  0x1a   :  { %962 = vmatprep.subr.bf16.mxu0 %v1047_v27  ;;  %930 = vmatprep.mubr.msk.f32.mxu0 %vm1048_vm2, %v1049_v37  ;;  %s1064_s12 = smov 72  }
  0x1b   :  { %1002 = vset.pattern.permute.xlu0 %v1051_v25  ;;  %540 = vperm.xlu1 %1001, %v1100_v1  }
  0x1c   :  { %958 = vmatpush3.bf16.msra.mxu1 %v955_v10  ;;  %964 = vmatpush3.bf16.msra.mxu0 %v963_v30  ;;  %v1056_v30 = vmov 7  }
  0x1d   :  { %971 = vmatprep.subr.bf16.mxu1 %v1047_v27  ;;  %965 = vmatprep.subr.bf16.mxu0 %v1047_v27 }
  0x1e   :  { %560 = vperm.xlu0 %1002, %v1100_v1  }
  0x1f   :  { %544 = vperm.xlu1 %1001, %v1105_v2  }
  0x20   :  { %967 = vmatpush3.bf16.msra.mxu0 %v966_v33 }
  0x21   :  { %968 = vmatprep.subr.bf16.mxu0 %v1047_v27 }
  0x22   :  { %716 = vperm.xlu0 %1002, %v1112_v3  }
  0x23   :  { %1003 = vset.pattern.permute.xlu1 %v1051_v25 }
  0x24   :  { %970 = vmatpush3.bf16.msra.mxu0 %v969_v36  ;;  %564 = vperm.xlu1 %1003, %v1105_v2  }
  0x26   :  { %1006 = vset.pattern.permute.xlu0 %v1052_v26 }
  0x27   :  { %584 = vperm.xlu0 %1006, %v1105_v2  }
  0x28   :  { %1004 = vset.pattern.permute.xlu1 %v1052_v26 }
  0x29   :  { %580 = vperm.xlu1 %1004, %v1100_v1  }
  0x2b   :  { %740 = vperm.xlu0 %1006, %v1121_v7  }
  0x2d   :  { %1005 = vset.pattern.permute.xlu1 %v1050_v24 }
  0x2e   :  { %696 = vperm.xlu1 %1005, %v1112_v3  }
  0x32   :  { %700 = vperm.xlu1 %1005, %v1121_v7  }
  0x36   :  { %1007 = vset.pattern.permute.xlu1 %v1051_v25 }
  0x37   :  { %720 = vperm.xlu1 %1007, %v1121_v7  }
  0x3b   :  { %1008 = vset.pattern.permute.xlu1 %v1052_v26 }
  0x3c   :  { %736 = vperm.xlu1 %1008, %v1112_v3  }
  0xe8   :  { %v896_v12 = vpop.f32.mrb[0].mxu0 }
  0xe9   :  { %v122_v13 = vadd.f32 %v896_v12, %v846_v11  ;;  %v116_v14 = vpop.f32.mrb[1].mxu0 }
  0xea   :  { %v117_v15 = vadd.f32 %v846_v11, %v116_v14  ;;  %v362_v14 = vld [vmem:[#allocation2 + $0x80] sm:$0xff] }
  0xeb   :  { %v136_v18 = vmax.f32 %v122_v13, 0.0  ;;  %v361_v13 = vld [vmem:[#allocation2 + $0x78] sm:$0xff] }
  0xec   :  { %v135_v16 = vmax.f32 %v117_v15, 0.0  ;;  %v899_v17 = vpop.f32.mrb[2].mxu0  ;;  %v975_v15 = vpack.c.bf16 %v362_v14, %v361_v13 }
  0xed   :  { %v132_v19 = vadd.f32 %v899_v17, %v846_v11  ;;  %v126_v20 = vpop.f32.mrb[3].mxu0 }
  0xee   :  { %v127_v21 = vadd.f32 %v846_v11, %v126_v20  ;;  %908 = vmatprep.mubr.msk.f32.mxu1 %vm148_vm1, %v135_v16  ;;  %v856_v16 = vld [vmem:[#allocation2 + $0x9a] ss:$0 sm:$0xff] }
  0xef   :  { %909 = vmatmul.mubr.msk.f32.vlgmr.msra.gmra.mrb[0].mxu1 %vm148_vm1, %v136_v18  ;;  %v138_v23 = vmax.f32 %v132_v19, 0.0 }
  0xf0   :  { %v137_v22 = vmax.f32 %v127_v21, 0.0  ;;  %973 = vmatpush3.bf16.msra.mxu1 %v972_v40  ;;  %v442_v21 = vld [vmem:[#allocation2 + $0x88] sm:$0xff] }
  0xf1   :  { %974 = vmatprep.subr.bf16.mxu1 %v1047_v27 }
  0xf2   :  { %911 = vmatprep.mubr.msk.f32.mxu1 %vm148_vm1, %v137_v22  ;;  %v443_v22 = vld [vmem:[#allocation2 + $0x90] sm:$0xff] }
  0xf3   :  { %912 = vmatmul.mubr.msk.f32.gmra.mrb[2].mxu1 %vm148_vm1, %v138_v23  ;;  %v978_v23 = vpack.c.bf16 %v443_v22, %v442_v21 }
  0xf4   :  { %941 = vmatprep.mubr.msk.f32.mxu1 %vm1048_vm2, %v1049_v37  ;;  %976 = vmatpush3.bf16.msra.mxu1 %v975_v15 }
  0xf5   :  { %977 = vmatprep.subr.bf16.mxu1 %v1047_v27  ;;  %v1053_v27 = vmov 4  }
  0xf6   :  { %1009 = vset.pattern.permute.xlu0 %v1053_v27  ;;  %1010 = vset.pattern.permute.xlu1 %v1053_v27 }
  0xf7   :  { %600 = vperm.xlu0 %1009, %v1100_v1   ;;  %604 = vperm.xlu1 %1010, %v1105_v2  }
  0xfb   :  { %760 = vperm.xlu0 %1009, %v1121_v7   ;;  %756 = vperm.xlu1 %1010, %v1112_v3  }
  0xff   :  { %1012 = vset.pattern.permute.xlu0 %v1054_v28  ;;  %1011 = vset.pattern.permute.xlu1 %v1054_v28 }
 0x100   :  { %776 = vperm.xlu0 %1012, %v1112_v3   ;;  %620 = vperm.xlu1 %1011, %v1100_v1  }
 0x104   :  { %1014 = vset.pattern.permute.xlu0 %v1055_v29  ;;  %624 = vperm.xlu1 %1011, %v1105_v2  }
 0x105   :  { %644 = vperm.xlu0 %1014, %v1105_v2  }
 0x108   :  { %780 = vperm.xlu1 %1011, %v1121_v7  }
 0x109   :  { %1015 = vset.pattern.permute.xlu0 %v1056_v30 }
 0x10a   :  { %660 = vperm.xlu0 %1015, %v1100_v1  }
 0x10c   :  { %1013 = vset.pattern.permute.xlu1 %v1055_v29 }
 0x10d   :  { %640 = vperm.xlu1 %1013, %v1100_v1  }
 0x10e   :  { %820 = vperm.xlu0 %1015, %v1121_v7  }
 0x111   :  { %796 = vperm.xlu1 %1013, %v1112_v3  }
 0x112   :  { %1017 = vset.pattern.permute.xlu0 %v1057_v31 }
 0x113   :  { %526 = vperm.xlu0 %1017, %v1100_v1   ;;  %v541_v1 = vpop.permute.xlu1 %540 }
 0x115   :  { %800 = vperm.xlu1 %1013, %v1121_v7  }
 0x117   :  { %530 = vperm.xlu0 %1017, %v1105_v2  }
 0x119   :  { %1016 = vset.pattern.permute.xlu1 %v1056_v30 }
 0x11a   :  { %664 = vperm.xlu1 %1016, %v1105_v2  }
 0x11b   :  { %686 = vperm.xlu0 %1017, %v1121_v7  }
 0x11e   :  { %816 = vperm.xlu1 %1016, %v1112_v3  }
 0x11f   :  { %1019 = vset.pattern.permute.xlu0 %v1056_v30 }
 0x122   :  { %1018 = vset.pattern.permute.xlu1 %v1057_v31 }
 0x123   :  { %682 = vperm.xlu1 %1018, %v1112_v3   ;;  %v561_v3 = vpop.permute.xlu0 %560 }
 0x1c2   :  { %v910_v42 = vpop.f32.mrb[0].mxu1 }
 0x1c3   :  { %v233_v43 = vadd.f32 %v910_v42, %v851_v41  ;;  %v227_v44 = vpop.f32.mrb[1].mxu1  ;;  %v533_v42 = vlaneseq }
 0x1c4   :  { %v228_v45 = vadd.f32 %v851_v41, %v227_v44 }
 0x1c5   :  { %v247_v46 = vmax.f32 %v233_v43, 0.0  ;;  %v534_v44 = vshrl.u32 %v533_v42, 7 }
 0x1c6   :  { %v246_v47 = vmax.f32 %v228_v45, 0.0  ;;  %v913_v48 = vpop.f32.mrb[2].mxu1  ;;  %v860_v45 = vld [vmem:[#allocation2 + $0x9c] ss:$0 sm:$0xff] }
 0x1c7   :  { %v252_v49 = vsel %vm250_vm3, %v247_v46, -inf  ;;  %v243_v50 = vadd.f32 %v913_v48, %v851_v41  ;;  %v237_v51 = vpop.f32.mrb[3].mxu1  ;;  %v535_v46 = vsub.s32 0, %v534_v44 }
 0x1c8   :  { %v251_v52 = vsel %vm250_vm3, %v246_v47, -inf  ;;  %v238_v53 = vadd.f32 %v851_v41, %v237_v51  ;;  %v717_v51 = vpop.permute.xlu0 %716 }
 0x1c9   :  { %v253_v54 = vmax.f32 %v251_v52, %v252_v49  ;;  %v249_v55 = vmax.f32 %v243_v50, 0.0 }
 0x1ca   :  { %v248_v56 = vmax.f32 %v238_v53, 0.0  ;;  %v691_v53 = vsub.s32 1, %v534_v44 }
 0x1cb   :  { %v254_v57 = vrot.slane %v253_v54, 4  ;;  %v261_v58 = vsel %vm250_vm3, %v249_v55, -inf }
 0x1cc   :  { %v260_v59 = vsel %vm250_vm3, %v248_v56, -inf }
 0x1cd   :  { %v255_v60 = vmax.f32 %v253_v54, %v254_v57  ;;  %v262_v61 = vmax.f32 %v260_v59, %v261_v58  ;;  %v585_v57 = vpop.permute.xlu0 %584 }
 0x1cf   :  { %v256_v62 = vrot.slane %v255_v60, 2  ;;  %v263_v63 = vrot.slane %v262_v61, 4 }
 0x1d1   :  { %v257_v0 = vmax.f32 %v255_v60, %v256_v62  ;;  %v264_v4 = vmax.f32 %v262_v61, %v263_v63 }
 0x1d3   :  { %v265_v5 = vrot.slane %v264_v4, 2  ;;  %v258_v6 = vrot.slane %v257_v0, 1 }
 0x1d5   :  { %v266_v8 = vmax.f32 %v264_v4, %v265_v5  ;;  %v259_v10 = vmax.f32 %v257_v0, %v258_v6  ;;  %v741_v0 = vpop.permute.xlu0 %740 }
 0x1d7   :  { %v267_v9 = vrot.slane %v266_v8, 1 }
 0x1d9   :  { %v268_v11 = vmax.f32 %v266_v8, %v267_v9  ;;  %v601_v8 = vpop.permute.xlu0 %600 }
 0x1db   :  { %v285_v12 = vsel %vm284_vm4, %v268_v11, %v259_v10 }
 0x1dc   :  { %931 = vmatmul.mubr.msk.f32.vlgmr.msra.gmra.mrb[4].mxu0 %vm250_vm3, %v285_v12 }
 0x1dd   :  { %v761_v14 = vpop.permute.xlu0 %760 }
 0x2af   :  { %v354_v17 = vpop.f32.mrb[4].mxu0 }
 0x2b0   :  { %v355_v18 = vadd.f32 %v856_v16, %v354_v17  ;;  %v932_v19 = vpop.f32.mrb[5].mxu0 }
 0x2b2   :  { %v358_v20 = vmax.f32 %v355_v18, 0.0  ;;  %v777_v18 = vpop.permute.xlu0 %776 }
 0x2b4   :  { %942 = vmatmul.mubr.msk.f32.vlgmr.msra.gmra.mrb[4].mxu1 %vm148_vm1, %v358_v20 }
 0x2b5   :  { %948 = vmatprep.mubr.msk.f32.mxu1 %vm1048_vm2, %v1049_v37  ;;  %979 = vmatpush3.bf16.msra.mxu1 %v978_v23  ;;  %v545_v37 = vpop.permute.xlu1 %544 }
 0x2b6   :  { %v645_v24 = vpop.permute.xlu0 %644 }
 0x2b9   :  { %v565_v38 = vpop.permute.xlu1 %564 }
 0x2ba   :  { %v661_v28 = vpop.permute.xlu0 %660 }
 0x2bd   :  { %v581_v39 = vpop.permute.xlu1 %580 }
 0x2c1   :  { %v697_v7 = vpop.permute.xlu1 %696 }
 0x2c5   :  { %v701_v40 = vpop.permute.xlu1 %700 }
 0x2c9   :  { %v721_v41 = vpop.permute.xlu1 %720 }
 0x2cd   :  { %v737_v2 = vpop.permute.xlu1 %736 }
 0x2d1   :  { %v1177_v43 = vpop.permute.xlu1 %604 }
 0x2d5   :  { %v757_v47 = vpop.permute.xlu1 %756 }
 0x2d9   :  { %v621_v56 = vpop.permute.xlu1 %620 }
 0x2dd   :  { %v625_v61 = vpop.permute.xlu1 %624 }
 0x2e1   :  { %v781_v6 = vpop.permute.xlu1 %780 }
 0x2e5   :  { %v641_v11 = vpop.permute.xlu1 %640 }
 0x2e9   :  { %v797_v17 = vpop.permute.xlu1 %796 }
 0x2ed   :  { %v801_v21 = vpop.permute.xlu1 %800 }
 0x2f1   :  { %v665_v27 = vpop.permute.xlu1 %664 }
 0x2f5   :  { %v817_v31 = vpop.permute.xlu1 %816 }
 0x387   :  { %v437_v33 = vpop.f32.mrb[4].mxu1 }
 0x388   :  { %v438_v34 = vadd.f32 %v858_v32, %v437_v33  ;;  %v943_v35 = vpop.f32.mrb[5].mxu1 }
 0x38a   :  { %v441_v36 = vmax.f32 %v438_v34, 0.0 }
 0x38c   :  { %949 = vmatmul.mubr.msk.f32.vlgmr.msra.gmra.mrb[6].mxu1 %vm449_vm5, %v441_v36 }
 0x45f   :  { %v519_v48 = vpop.f32.mrb[6].mxu1 }
 0x460   :  { %v520_v49 = vadd.f32 %v860_v45, %v519_v48  ;;  %v950_v50 = vpop.f32.mrb[7].mxu1 }
 0x462   :  { %524 = vst.msk [vmem:[%s1242_s3] sm:$0x3] %vm523_vm6, %v520_v49  ;;  %v1182_v52 = vrot.slane %v520_v49, %v535_v46  ;;  %v1188_v58 = vrot.slane %v520_v49, %v691_v53  ;;  %s1059_s3 = smov 112  }
 0x464   :  { %v548_v54 = vmul.f32 %v545_v37, %v1182_v52  ;;  %v547_v55 = vmul.f32 %v541_v1, %v1182_v52  ;;  %v567_v59 = vmul.f32 %v561_v3, %v1182_v52  ;;  %v568_v60 = vmul.f32 %v565_v38, %v1182_v52  ;;  %v821_v1 = vpop.permute.xlu0 %820 }
 0x465   :  { %v587_v62 = vmul.f32 %v581_v39, %v1182_v52  ;;  %v723_v63 = vmul.f32 %v717_v51, %v1188_v58  ;;  %v588_v4 = vmul.f32 %v585_v57, %v1182_v52  ;;  %v743_v5 = vmul.f32 %v737_v2, %v1188_v58 }
 0x466   :  { %553 = vrot.lane.b32.xlu1 %v548_v54, %s1058_s7  ;;  %551 = vrot.lane.b32.xlu0 %v547_v55, %s1058_s7  ;;  %v703_v9 = vmul.f32 %v697_v7, %v1188_v58  ;;  %v607_v10 = vmul.f32 %v601_v8, %v1182_v52  ;;  %v704_v12 = vmul.f32 %v701_v40, %v1188_v58  ;;  %v683_v40 = vpop.permute.xlu1 %682 }
 0x467   :  { %v763_v13 = vmul.f32 %v757_v47, %v1188_v58  ;;  %v724_v15 = vmul.f32 %v721_v41, %v1188_v58  ;;  %v627_v16 = vmul.f32 %v621_v56, %v1182_v52  ;;  %v744_v19 = vmul.f32 %v741_v0, %v1188_v58 }
 0x468   :  { %v783_v20 = vmul.f32 %v777_v18, %v1188_v58  ;;  %v608_v22 = vmul.f32 %v1177_v43, %v1182_v52  ;;  %v647_v23 = vmul.f32 %v641_v11, %v1182_v52  ;;  %v764_v25 = vmul.f32 %v761_v14, %v1188_v58  ;;  %v527_v38 = vpop.permute.xlu0 %526 }
 0x469   :  { %v803_v26 = vmul.f32 %v797_v17, %v1188_v58  ;;  %v628_v29 = vmul.f32 %v625_v61, %v1182_v52  ;;  %v667_v30 = vmul.f32 %v661_v28, %v1182_v52  ;;  %v784_v32 = vmul.f32 %v781_v6, %v1188_v58 }
 0x46a   :  { %571 = vrot.lane.b32.xlu1 %v567_v59, %s1059_s3  ;;  %573 = vrot.lane.b32.xlu0 %v568_v60, %s1059_s3  ;;  %v823_v33 = vmul.f32 %v817_v31, %v1188_v58  ;;  %v648_v34 = vmul.f32 %v645_v24, %v1182_v52  ;;  %v804_v35 = vmul.f32 %v801_v21, %v1188_v58 }
 0x46b   :  { %v668_v36 = vmul.f32 %v665_v27, %v1182_v52  ;;  %v824_v37 = vmul.f32 %v821_v1, %v1188_v58  ;;  %v693_v54 = vmul.f32 %v1188_v58, %v683_v40  ;;  %v537_v55 = vmul.f32 %v1182_v52, %v527_v38 }
 0x46c   :  { %v531_v39 = vpop.permute.xlu0 %530 }
 0x46d   :  { %v538_v17 = vmul.f32 %v1182_v52, %v531_v39 }
 0x46e   :  { %591 = vrot.lane.b32.xlu1 %v587_v62, %s1060_s8  ;;  %727 = vrot.lane.b32.xlu0 %v723_v63, %s1059_s3 }
 0x470   :  { %v687_v7 = vpop.permute.xlu0 %686 }
 0x472   :  { %593 = vrot.lane.b32.xlu1 %v588_v4, %s1060_s8  ;;  %747 = vrot.lane.b32.xlu0 %v743_v5, %s1060_s8 }
 0x476   :  { %707 = vrot.lane.b32.xlu1 %v703_v9, %s1058_s7  ;;  %611 = vrot.lane.b32.xlu0 %v607_v10, %s1061_s9 }
 0x47a   :  { %709 = vrot.lane.b32.xlu1 %v704_v12, %s1058_s7  ;;  %767 = vrot.lane.b32.xlu0 %v763_v13, %s1061_s9 }
 0x47e   :  { %729 = vrot.lane.b32.xlu1 %v724_v15, %s1059_s3  ;;  %631 = vrot.lane.b32.xlu0 %v627_v16, %s1062_s10 }
 0x482   :  { %749 = vrot.lane.b32.xlu1 %v744_v19, %s1060_s8  ;;  %787 = vrot.lane.b32.xlu0 %v783_v20, %s1062_s10 }
 0x486   :  { %613 = vrot.lane.b32.xlu1 %v608_v22, %s1061_s9  ;;  %651 = vrot.lane.b32.xlu0 %v647_v23, %s1063_s11  ;;  %v694_v23 = vmul.f32 %v1188_v58, %v687_v7 }
 0x48a   :  { %769 = vrot.lane.b32.xlu1 %v764_v25, %s1061_s9  ;;  %807 = vrot.lane.b32.xlu0 %v803_v26, %s1063_s11 }
 0x48e   :  { %633 = vrot.lane.b32.xlu1 %v628_v29, %s1062_s10  ;;  %671 = vrot.lane.b32.xlu0 %v667_v30, %s1064_s12 }
 0x492   :  { %789 = vrot.lane.b32.xlu1 %v784_v32, %s1062_s10  ;;  %827 = vrot.lane.b32.xlu0 %v823_v33, %s1064_s12 }
 0x496   :  { %653 = vrot.lane.b32.xlu1 %v648_v34, %s1063_s11 }
 0x49a   :  { %809 = vrot.lane.b32.xlu1 %v804_v35, %s1063_s11 }
 0x49e   :  { %673 = vrot.lane.b32.xlu1 %v668_v36, %s1064_s12 }
 0x4a2   :  { %829 = vrot.lane.b32.xlu1 %v824_v37, %s1064_s12 }
 0x4d8   :  { %v554_v41 = vpop.permute.xlu1 %553  ;;  %v552_v2 = vpop.permute.xlu0 %551 }
 0x4d9   :  { %v557_v60 = vadd.f32 %v552_v2, %v537_v55  ;;  %v558_v21 = vadd.f32 %v554_v41, %v538_v17 }
 0x4dc   :  { %v572_v42 = vpop.permute.xlu1 %571  ;;  %v574_v43 = vpop.permute.xlu0 %573 }
 0x4dd   :  { %v577_v61 = vadd.f32 %v572_v42, %v557_v60  ;;  %v578_v24 = vadd.f32 %v574_v43, %v558_v21 }
 0x4e0   :  { %v592_v44 = vpop.permute.xlu1 %591  ;;  %v728_v3 = vpop.permute.xlu0 %727 }
 0x4e1   :  { %v597_v4 = vadd.f32 %v592_v44, %v577_v61 }
 0x4e4   :  { %v594_v45 = vpop.permute.xlu1 %593  ;;  %v748_v46 = vpop.permute.xlu0 %747 }
 0x4e5   :  { %v598_v52 = vadd.f32 %v594_v45, %v578_v24 }
 0x4e8   :  { %v708_v47 = vpop.permute.xlu1 %707  ;;  %v612_v48 = vpop.permute.xlu0 %611 }
 0x4e9   :  { %v713_v56 = vadd.f32 %v708_v47, %v693_v54  ;;  %v617_v5 = vadd.f32 %v612_v48, %v597_v4 }
 0x4eb   :  { %v733_v62 = vadd.f32 %v728_v3, %v713_v56 }
 0x4ec   :  { %v710_v49 = vpop.permute.xlu1 %709  ;;  %v768_v50 = vpop.permute.xlu0 %767 }
 0x4ed   :  { %v753_v6 = vadd.f32 %v748_v46, %v733_v62  ;;  %v714_v26 = vadd.f32 %v710_v49, %v694_v23 }
 0x4ef   :  { %v773_v11 = vadd.f32 %v768_v50, %v753_v6 }
 0x4f0   :  { %v730_v51 = vpop.permute.xlu1 %729  ;;  %v632_v53 = vpop.permute.xlu0 %631 }
 0x4f1   :  { %v637_v10 = vadd.f32 %v632_v53, %v617_v5  ;;  %v734_v27 = vadd.f32 %v730_v51, %v714_v26 }
 0x4f4   :  { %v750_v57 = vpop.permute.xlu1 %749  ;;  %v788_v59 = vpop.permute.xlu0 %787 }
 0x4f5   :  { %v793_v15 = vadd.f32 %v788_v59, %v773_v11  ;;  %v754_v30 = vadd.f32 %v750_v57, %v734_v27 }
 0x4f8   :  { %v614_v63 = vpop.permute.xlu1 %613  ;;  %v652_v0 = vpop.permute.xlu0 %651 }
 0x4f9   :  { %v657_v12 = vadd.f32 %v652_v0, %v637_v10  ;;  %v618_v28 = vadd.f32 %v614_v63, %v598_v52 }
 0x4fc   :  { %v770_v8 = vpop.permute.xlu1 %769  ;;  %v808_v9 = vpop.permute.xlu0 %807 }
 0x4fd   :  { %v813_v18 = vadd.f32 %v808_v9, %v793_v15  ;;  %v774_v32 = vadd.f32 %v770_v8, %v754_v30 }
 0x500   :  { %v634_v13 = vpop.permute.xlu1 %633  ;;  %v672_v14 = vpop.permute.xlu0 %671 }
 0x501   :  { %v677_v16 = vadd.f32 %v672_v14, %v657_v12  ;;  %v638_v31 = vadd.f32 %v634_v13, %v618_v28 }
 0x503   :  { %679 = vst.msk [vmem:[%s1241_s2] sm:$0xff] %vm37_vm0, %v677_v16 }
 0x504   :  { %v790_v19 = vpop.permute.xlu1 %789  ;;  %v828_v20 = vpop.permute.xlu0 %827 }
 0x505   :  { %v833_v22 = vadd.f32 %v828_v20, %v813_v18  ;;  %v794_v35 = vadd.f32 %v790_v19, %v774_v32 }
 0x507   :  { %835 = vst.msk [vmem:[%s1241_s2 + $0x10] sm:$0xff] %vm37_vm0, %v833_v22 }
 0x508   :  { %v654_v25 = vpop.permute.xlu1 %653 }
 0x509   :  { %v658_v33 = vadd.f32 %v654_v25, %v638_v31 }
 0x50c   :  { %v810_v29 = vpop.permute.xlu1 %809 }
 0x50d   :  { %v814_v58 = vadd.f32 %v810_v29, %v794_v35 }
 0x510   :  { %v674_v34 = vpop.permute.xlu1 %673 }
 0x511   :  { %v678_v36 = vadd.f32 %v674_v34, %v658_v33 }
 0x513   :  { %680 = vst.msk [vmem:[%s1241_s2 + $0x8] sm:$0xff] %vm37_vm0, %v678_v36 }
 0x514   :  { %v830_v1 = vpop.permute.xlu1 %829 }
 0x515   :  { %v834_v37 = vadd.f32 %v830_v1, %v814_v58 }
 0x517   :  { %836 = vst.msk [vmem:[%s1241_s2 + $0x18] sm:$0xff] %vm37_vm0, %v834_v37 }
 0x518   :  { %845 = vsyncpa [#allocation3], 1 }

</bundles_post_ra>
